<compile_context>
chip_gen: v7x
topology: tpu7x:2x2x1
jax: 0.10.0
libtpu: 0.0.40
codegen_flags: <defaults>
</compile_context>

<pallas_src>
import functools
import math
from typing import NamedTuple

import jax
import jax.numpy as jnp
from jax import lax
from jax.experimental import pallas as pl
from jax.experimental.pallas import tpu as pltpu


# ----------------------------------------------------------------------------
# Pallas kernel
# ----------------------------------------------------------------------------
def _resblock_kernel(x_ref, w1_ref, w2_ref, s1_ref, s2_ref, o_ref,
                     xpad_s, ypad_s, *, bt, h, w, cp, wt):
    """Fused conv3x3+BN+ReLU -> conv3x3+BN -> (+x) -> ReLU for bt images.

    x_ref / o_ref : (bt, H, (W+2)*Cp) f32, W-pad lanes are zero on input.
    w1_ref/w2_ref : (3, Kin, Kout) bf16 block-band weight matrices.
    s1_ref/s2_ref : (1, (W+2)*Cp) f32 per-channel shifts tiled over W.
    xpad_s/ypad_s : (bt*(H+2), (W+2)*Cp) f32 scratches (H zero padding).
    """
    hp = h + 2                       # rows per padded image block
    wpc = (w + 2) * cp               # lane width of the W-padded layout
    n_wt = w // wt                   # number of W column tiles
    m_rows = bt * hp                 # rows in the stacked padded scratch
    m_dot = m_rows - 2               # M rows fed to each dy-shifted MXU dot

    zero_row = jnp.zeros((1, wpc), jnp.float32)

    # Stage the input block into the H-padded stacked scratch.  W-pad lanes
    # arrive already zero from HBM; only the 2 border rows per image are
    # (re)zeroed each step - no full zero-fill of the scratch.
    for b in range(bt):                                    # bt small & static
        xpad_s[b * hp:b * hp + 1, :] = zero_row
        xpad_s[b * hp + h + 1:b * hp + h + 2, :] = zero_row
        xpad_s[b * hp + 1:b * hp + 1 + h, :] = x_ref[b]

    def band_conv(pad_ref, w_ref, lane_lo, k_cols):
        # One MXU dot per kernel row: bf16 operands, f32 accumulation.
        acc = None
        for dy in range(3):                                # static unroll
            lhs = pad_ref[dy:dy + m_dot, lane_lo:lane_lo + k_cols]
            d = jnp.dot(lhs.astype(jnp.bfloat16), w_ref[dy],
                        preferred_element_type=jnp.float32)
            acc = d if acc is None else acc + d
        return acc                                         # (m_dot, n_cols) f32

    # ---- ConvLayer 1: conv3x3 (BN scale folded) + shift + ReLU -> ypad ----
    if n_wt == 1:
        # Single W tile: weights emit the full padded width (zero columns at
        # the two W-pad positions), so the store is full-width, lane offset 0.
        y = jnp.maximum(band_conv(xpad_s, w1_ref, 0, wpc) + s1_ref[...], 0.0)
        ypad_s[1:1 + m_dot, :] = y
    else:
        # TODO(synk): interior lane offsets (t*wt+1)*cp are 128-aligned only
        # when cp % 128 == 0 (true for realistic channel counts).
        for t in range(n_wt):
            lo_in = t * wt * cp
            lo_out = (t * wt + 1) * cp
            y = jnp.maximum(
                band_conv(xpad_s, w1_ref, lo_in, (wt + 2) * cp)
                + s1_ref[0:1, lo_out:lo_out + wt * cp], 0.0)
            ypad_s[1:1 + m_dot, lo_out:lo_out + wt * cp] = y
        ypad_s[:, 0:cp] = jnp.zeros((m_rows, cp), jnp.float32)
        ypad_s[:, wpc - cp:wpc] = jnp.zeros((m_rows, cp), jnp.float32)

    # Rows at image boundaries received garbage (cross-image windows): the
    # boundary pad rows of ypad are re-zeroed AFTER the conv1 store.
    for b in range(bt):
        ypad_s[b * hp:b * hp + 1, :] = zero_row
        ypad_s[b * hp + h + 1:b * hp + h + 2, :] = zero_row

    # ---- ConvLayer 2 (activation=False) + identity shortcut + final ReLU ----
    if n_wt == 1:
        z = band_conv(ypad_s, w2_ref, 0, wpc) + s2_ref[...]
        for b in range(bt):
            # Re-read x_ref here (residual) instead of keeping x live across
            # both convs.
            o_ref[b] = jnp.maximum(x_ref[b] + z[b * hp:b * hp + h, :], 0.0)
    else:
        for t in range(n_wt):
            lo_in = t * wt * cp
            lo_out = (t * wt + 1) * cp
            z = (band_conv(ypad_s, w2_ref, lo_in, (wt + 2) * cp)
                 + s2_ref[0:1, lo_out:lo_out + wt * cp])
            for b in range(bt):
                o_ref[b, :, lo_out:lo_out + wt * cp] = jnp.maximum(
                    x_ref[b, :, lo_out:lo_out + wt * cp]
                    + z[b * hp:b * hp + h, :], 0.0)
        zcol = jnp.zeros((h, cp), jnp.float32)
        for b in range(bt):               # keep the output's W-pad lanes zero
            o_ref[b, :, 0:cp] = zcol
            o_ref[b, :, wpc - cp:wpc] = zcol


# ----------------------------------------------------------------------------
# One-time parameter preparation (hoisted out of the jitted forward)
# ----------------------------------------------------------------------------
class ResBlockConfig(NamedTuple):
    c: int      # real channels
    cp: int     # padded channels (lane alignment)
    h: int
    w: int
    wt: int     # W column tile


def _fold_bn(w_hwio, gamma, beta, mean, var, eps=1e-5):
    """Fold eval-mode BatchNorm into conv weights + per-channel shift."""
    scale = gamma / jnp.sqrt(var + eps)
    return w_hwio * scale[None, None, None, :], beta - mean * scale


def _band_weights(w_hwio, in_cols, out_cols, dx_shift, zero_cols=()):
    """(3,3,Cp,Cp) taps -> (3, in_cols*Cp, out_cols*Cp) block-band matrices.

    B[dy][i*Cp+ci, j*Cp+co] = w[dy, i - j + dx_shift, ci, co] when the tap
    index lies in [0,3), else 0; output column blocks in `zero_cols` are
    forced to zero (used for the W-pad output positions of the single tile).
    """
    kh, kw, cin, cout = w_hwio.shape
    i = jnp.arange(in_cols)[:, None]
    j = jnp.arange(out_cols)[None, :]
    dx = i - j + dx_shift
    valid = (dx >= 0) & (dx < kw)
    if zero_cols:
        zc = jnp.zeros((out_cols,), bool).at[jnp.array(zero_cols)].set(True)
        valid = valid & ~zc[None, :]
    taps = jnp.where(valid[None, :, :, None, None],
                     w_hwio[:, jnp.clip(dx, 0, kw - 1)], 0.0)
    return taps.transpose(0, 1, 3, 2, 4).reshape(kh, in_cols * cin,
                                                 out_cols * cout)


def _pick_cp(c, w, lane=128):
    """Pad channels so W*Cp is a multiple of 128 (bounded to <= 2x padding)."""
    mult = lane // math.gcd(w, lane)
    cp = ((c + mult - 1) // mult) * mult
    return cp if cp <= 2 * c else c


def _pick_wt(w, cp, target_k=256):
    """Largest W tile (divisor of W) with K = (Wt+2)*Cp <= target_k."""
    divisors = [d for d in range(1, w + 1) if w % d == 0]
    fits = [d for d in divisors if (d + 2) * cp <= target_k]
    aligned = [d for d in fits if (d * cp) % 128 == 0]
    if aligned:
        return max(aligned)
    return max(fits) if fits else 1


def _pick_b_tile(n, h, target_m=256):
    """Images stacked per grid step so the MXU M dim ~ target_m rows."""
    # TODO(synk): on v7x cap bt at n//2 for tiny batches so both TensorCores
    #             still get a grid step.
    bt = max(1, min(n, target_m // (h + 2)))
    while n % bt:
        bt -= 1
    return bt


def prepare_resblock_params(params, *, c, h, w, eps=1e-5):
    """BN fold + channel pad + block-band weight build + shift tiling.

    Runs once (outside the jitted forward); returns device constants + config.
    """
    cp = _pick_cp(c, w)
    wt = _pick_wt(w, cp)
    n_wt = w // wt
    wpc = (w + 2) * cp

    w1f, s1 = _fold_bn(params["w1"], params["g1"], params["be1"],
                       params["m1"], params["v1"], eps)
    w2f, s2 = _fold_bn(params["w2"], params["g2"], params["be2"],
                       params["m2"], params["v2"], eps)

    def pad_c(wf, s):
        if cp != c:
            wf = jnp.pad(wf, ((0, 0), (0, 0), (0, cp - c), (0, cp - c)))
            s = jnp.pad(s, (0, cp - c))
        return wf, s

    w1f, s1 = pad_c(w1f, s1)
    w2f, s2 = pad_c(w2f, s2)

    if n_wt == 1:
        b1 = _band_weights(w1f, w + 2, w + 2, 1, zero_cols=(0, w + 1))
        b2 = _band_weights(w2f, w + 2, w + 2, 1, zero_cols=(0, w + 1))
    else:
        b1 = _band_weights(w1f, wt + 2, wt, 0)
        b2 = _band_weights(w2f, wt + 2, wt, 0)

    def shift_row(s):
        row = jnp.concatenate([jnp.zeros((cp,), s.dtype), jnp.tile(s, w),
                               jnp.zeros((cp,), s.dtype)])
        return row.reshape(1, wpc).astype(jnp.float32)

    consts = dict(b1=b1.astype(jnp.bfloat16), b2=b2.astype(jnp.bfloat16),
                  s1=shift_row(s1), s2=shift_row(s2))
    return consts, ResBlockConfig(c=c, cp=cp, h=h, w=w, wt=wt)


# ----------------------------------------------------------------------------
# Forward wrapper
# ----------------------------------------------------------------------------
def _resblock_pallas(x, b1, b2, s1, s2, *, bt, h, w, cp, wt):
    n = x.shape[0]
    wpc = (w + 2) * cp
    kin, kout = b1.shape[1], b1.shape[2]
    kernel = functools.partial(_resblock_kernel, bt=bt, h=h, w=w, cp=cp, wt=wt)

    flops = int(2 * 2 * 9 * h * w * cp * cp * n)          # 2 convs, 2 flops/MAC
    bytes_acc = int(2 * x.size * 4 + (b1.size + b2.size) * 2
                    + (s1.size + s2.size) * 4)

    return pl.pallas_call(
        kernel,
        out_shape=jax.ShapeDtypeStruct((n, h, wpc), jnp.float32),
        grid_spec=pltpu.PrefetchScalarGridSpec(
            num_scalar_prefetch=0,
            grid=(n // bt,),                               # bt images per step
            in_specs=[
                pl.BlockSpec((bt, h, wpc), lambda i: (i, 0, 0)),   # x slab
                pl.BlockSpec((3, kin, kout), lambda i: (0, 0, 0)), # band w1
                pl.BlockSpec((3, kin, kout), lambda i: (0, 0, 0)), # band w2
                pl.BlockSpec((1, wpc), lambda i: (0, 0)),          # shift1
                pl.BlockSpec((1, wpc), lambda i: (0, 0)),          # shift2
            ],
            out_specs=pl.BlockSpec((bt, h, wpc), lambda i: (i, 0, 0)),
            scratch_shapes=[
                pltpu.VMEM((bt * (h + 2), wpc), jnp.float32),  # H-padded input
                pltpu.VMEM((bt * (h + 2), wpc), jnp.float32),  # H-padded mid
            ]),
        compiler_params=pltpu.CompilerParams(
            dimension_semantics=("parallel",),             # megacore split
            vmem_limit_bytes=48 * 1024 * 1024),            # <= v7x 64 MiB VMEM
        cost_estimate=pl.CostEstimate(flops=flops, transcendentals=0,
                                      bytes_accessed=bytes_acc),
    )(x, b1, b2, s1, s2)


@functools.partial(jax.jit, static_argnames=("cfg",))
def resblock_forward(x_nchw, consts, cfg):
    n, c, h, w = x_nchw.shape
    assert (c, h, w) == (cfg.c, cfg.h, cfg.w)
    cp, wt = cfg.cp, cfg.wt
    wpc = (w + 2) * cp

    # NCHW (PyTorch) -> NHWC -> channel pad -> W pad -> lane-dense slabs.
    # TODO(synk): keep this padded lane-dense layout end-to-end across layers
    #             so this boundary transpose (extra HBM pass) disappears.
    x = jnp.transpose(x_nchw, (0, 2, 3, 1)).astype(jnp.float32)
    if cp != c:
        x = jnp.pad(x, ((0, 0), (0, 0), (0, 0), (0, cp - c)))
    x = jnp.pad(x, ((0, 0), (0, 0), (1, 1), (0, 0))).reshape(n, h, wpc)

    bt = _pick_b_tile(n, h)
    out = _resblock_pallas(x, consts["b1"], consts["b2"], consts["s1"],
                           consts["s2"], bt=bt, h=h, w=w, cp=cp, wt=wt)

    out = out.reshape(n, h, w + 2, cp)[:, :, 1:w + 1, :c]
    return jnp.transpose(out, (0, 3, 1, 2))               # back to NCHW


# ----------------------------------------------------------------------------
# Pure-JAX references
# ----------------------------------------------------------------------------
def resblock_reference_f32(x_nchw, params, eps=1e-5):
    """Faithful f32 reference of the PyTorch module."""
    x = jnp.transpose(x_nchw, (0, 2, 3, 1)).astype(jnp.float32)

    def conv_bn(inp, w, g, b, m, v, relu):
        y = lax.conv_general_dilated(
            inp, w, window_strides=(1, 1), padding="SAME",
            dimension_numbers=("NHWC", "HWIO", "NHWC"))
        y = g * (y - m) / jnp.sqrt(v + eps) + b
        return jnp.maximum(y, 0.0) if relu else y

    y = conv_bn(x, params["w1"], params["g1"], params["be1"],
                params["m1"], params["v1"], relu=True)
    y = conv_bn(y, params["w2"], params["g2"], params["be2"],
                params["m2"], params["v2"], relu=False)
    return jnp.transpose(jnp.maximum(x + y, 0.0), (0, 3, 1, 2))


def resblock_reference_mxu(x_nchw, params, eps=1e-5):
    """Same math at the kernel's precision (bf16 MXU operands, f32 accum)."""
    x = jnp.transpose(x_nchw, (0, 2, 3, 1)).astype(jnp.float32)
    w1f, s1 = _fold_bn(params["w1"], params["g1"], params["be1"],
                       params["m1"], params["v1"], eps)
    w2f, s2 = _fold_bn(params["w2"], params["g2"], params["be2"],
                       params["m2"], params["v2"], eps)

    def conv(inp, wf, s):
        y = lax.conv_general_dilated(
            inp.astype(jnp.bfloat16), wf.astype(jnp.bfloat16),
            window_strides=(1, 1), padding="SAME",
            dimension_numbers=("NHWC", "HWIO", "NHWC"),
            preferred_element_type=jnp.float32)
        return y + s

    y = jnp.maximum(conv(x, w1f, s1), 0.0)
    z = conv(y, w2f, s2)
    return jnp.transpose(jnp.maximum(x + z, 0.0), (0, 3, 1, 2))


# ----------------------------------------------------------------------------
# Deterministic parameters + smoke test
# ----------------------------------------------------------------------------
def make_params(key, c):
    ks = jax.random.split(key, 10)
    return {
        "w1": jax.random.normal(ks[0], (3, 3, c, c), jnp.float32) * 0.2,
        "g1": jax.random.uniform(ks[1], (c,), jnp.float32, 0.5, 1.5),
        "be1": jax.random.normal(ks[2], (c,), jnp.float32) * 0.1,
        "m1": jax.random.normal(ks[3], (c,), jnp.float32) * 0.1,
        "v1": jax.random.uniform(ks[4], (c,), jnp.float32, 0.5, 1.5),
        "w2": jax.random.normal(ks[5], (3, 3, c, c), jnp.float32) * 0.2,
        "g2": jax.random.uniform(ks[6], (c,), jnp.float32, 0.5, 1.5),
        "be2": jax.random.normal(ks[7], (c,), jnp.float32) * 0.1,
        "m2": jax.random.normal(ks[8], (c,), jnp.float32) * 0.1,
        "v2": jax.random.uniform(ks[9], (c,), jnp.float32, 0.5, 1.5),
    }


if __name__ == "__main__":
    N, C, H, W = 2, 4, 16, 16            # ResBlock(4, 4), identity shortcut
    key = jax.random.PRNGKey(0)
    kx, kp = jax.random.split(key)
    x = jax.random.normal(kx, (N, C, H, W), jnp.float32)    # NCHW like PyTorch
    params = make_params(kp, C)

    # One-time parameter preparation (hoisted out of the forward pass).
    consts, cfg = prepare_resblock_params(params, c=C, h=H, w=W)

    out = jax.block_until_ready(resblock_forward(x, consts, cfg=cfg))
    assert out.shape == (N, C, H, W)

    ref_mxu = jax.block_until_ready(resblock_reference_mxu(x, params))
    ref_f32 = jax.block_until_ready(resblock_reference_f32(x, params))

    err_tight = float(jnp.max(jnp.abs(out - ref_mxu)))
    err_f32 = float(jnp.max(jnp.abs(out - ref_f32)))
    assert jnp.allclose(out, ref_mxu, atol=2e-3, rtol=2e-3), (
        f"bf16-matched max abs err {err_tight}")
    assert jnp.allclose(out, ref_f32, atol=0.25, rtol=0.05), (
        f"f32 reference max abs err {err_f32}")

    print("KERNEL_OK")
</pallas_src>

<mosaic_0001>
module attributes {stable_mosaic.version = 11 : i64} {
  func.func @_resblock_kernel(%arg0: i32, %arg1: memref<2x16x144xf32, #tpu.memory_space<vmem>>, %arg2: memref<3x144x144xbf16, #tpu.memory_space<vmem>>, %arg3: memref<3x144x144xbf16, #tpu.memory_space<vmem>>, %arg4: memref<1x144xf32, #tpu.memory_space<vmem>>, %arg5: memref<1x144xf32, #tpu.memory_space<vmem>>, %arg6: memref<2x16x144xf32, #tpu.memory_space<vmem>>, %arg7: memref<36x144xf32, #tpu.memory_space<vmem>>, %arg8: memref<36x144xf32, #tpu.memory_space<vmem>>) attributes {dimension_semantics = [#tpu.dimension_semantics<parallel>], iteration_bounds = array<i64: 1>, scalar_prefetch = 0 : i64, scratch_operands = 2 : i64, tpu.core_type = #tpu.core_type<tc>, window_params = [{transform_indices = @transform_0, window_bounds = array<i64: 2, 16, 144>}, {pipeline_mode = #tpu.pipeline_mode<synchronous>, transform_indices = @transform_1, window_bounds = array<i64: 3, 144, 144>}, {pipeline_mode = #tpu.pipeline_mode<synchronous>, transform_indices = @transform_2, window_bounds = array<i64: 3, 144, 144>}, {pipeline_mode = #tpu.pipeline_mode<synchronous>, transform_indices = @transform_3, window_bounds = array<i64: 1, 144>}, {pipeline_mode = #tpu.pipeline_mode<synchronous>, transform_indices = @transform_4, window_bounds = array<i64: 1, 144>}, {transform_indices = @transform_5, window_bounds = array<i64: 2, 16, 144>}]} {
    %cst = arith.constant 0.000000e+00 : f32
    %0 = vector.broadcast %cst : f32 to vector<1x144xf32>
    %c0 = arith.constant 0 : index
    %c0_0 = arith.constant 0 : index
    %1 = vector.load %arg7[%c0, %c0_0] : memref<36x144xf32, #tpu.memory_space<vmem>>, vector<1x144xf32>
    tpu.vector_store %arg7[%c0, %c0_0], %0 {strides = array<i32>} : memref<36x144xf32, #tpu.memory_space<vmem>>, vector<1x144xf32>,
    %c17 = arith.constant 17 : index
    %c0_1 = arith.constant 0 : index
    %2 = vector.load %arg7[%c17, %c0_1] : memref<36x144xf32, #tpu.memory_space<vmem>>, vector<1x144xf32>
    tpu.vector_store %arg7[%c17, %c0_1], %0 {strides = array<i32>} : memref<36x144xf32, #tpu.memory_space<vmem>>, vector<1x144xf32>,
    %c0_2 = arith.constant 0 : index
    %c0_3 = arith.constant 0 : index
    %c0_4 = arith.constant 0 : index
    %3 = vector.load %arg1[%c0_2, %c0_3, %c0_4] : memref<2x16x144xf32, #tpu.memory_space<vmem>>, vector<1x16x144xf32>
    %4 = vector.shape_cast %3 : vector<1x16x144xf32> to vector<16x144xf32>
    %c1 = arith.constant 1 : index
    %c0_5 = arith.constant 0 : index
    %5 = vector.load %arg7[%c1, %c0_5] : memref<36x144xf32, #tpu.memory_space<vmem>>, vector<16x144xf32>
    tpu.vector_store %arg7[%c1, %c0_5], %4 {strides = array<i32>} : memref<36x144xf32, #tpu.memory_space<vmem>>, vector<16x144xf32>,
    %c18 = arith.constant 18 : index
    %c0_6 = arith.constant 0 : index
    %6 = vector.load %arg7[%c18, %c0_6] : memref<36x144xf32, #tpu.memory_space<vmem>>, vector<1x144xf32>
    tpu.vector_store %arg7[%c18, %c0_6], %0 {strides = array<i32>} : memref<36x144xf32, #tpu.memory_space<vmem>>, vector<1x144xf32>,
    %c35 = arith.constant 35 : index
    %c0_7 = arith.constant 0 : index
    %7 = vector.load %arg7[%c35, %c0_7] : memref<36x144xf32, #tpu.memory_space<vmem>>, vector<1x144xf32>
    tpu.vector_store %arg7[%c35, %c0_7], %0 {strides = array<i32>} : memref<36x144xf32, #tpu.memory_space<vmem>>, vector<1x144xf32>,
    %c1_8 = arith.constant 1 : index
    %c0_9 = arith.constant 0 : index
    %c0_10 = arith.constant 0 : index
    %8 = vector.load %arg1[%c1_8, %c0_9, %c0_10] : memref<2x16x144xf32, #tpu.memory_space<vmem>>, vector<1x16x144xf32>
    %9 = vector.shape_cast %8 : vector<1x16x144xf32> to vector<16x144xf32>
    %c19 = arith.constant 19 : index
    %c0_11 = arith.constant 0 : index
    %10 = vector.load %arg7[%c19, %c0_11] : memref<36x144xf32, #tpu.memory_space<vmem>>, vector<16x144xf32>
    tpu.vector_store %arg7[%c19, %c0_11], %9 {strides = array<i32>} : memref<36x144xf32, #tpu.memory_space<vmem>>, vector<16x144xf32>,
    %c0_12 = arith.constant 0 : index
    %c0_13 = arith.constant 0 : index
    %11 = vector.load %arg7[%c0_12, %c0_13] : memref<36x144xf32, #tpu.memory_space<vmem>>, vector<34x144xf32>
    %12 = arith.truncf %11 : vector<34x144xf32> to vector<34x144xbf16>
    %c0_14 = arith.constant 0 : index
    %c0_15 = arith.constant 0 : index
    %c0_16 = arith.constant 0 : index
    %13 = vector.load %arg2[%c0_14, %c0_15, %c0_16] : memref<3x144x144xbf16, #tpu.memory_space<vmem>>, vector<1x144x144xbf16>
    %14 = vector.shape_cast %13 : vector<1x144x144xbf16> to vector<144x144xbf16>
    %cst_17 = arith.constant dense<0.000000e+00> : vector<34x144xf32>
    %15 = tpu.matmul %12, %14, %cst_17 {dimension_numbers = #tpu.dot_dimension_numbers<[1], [0], [0], [1], [0, 0, 1, 1], [], []>} : vector<34x144xbf16>, vector<144x144xbf16>, vector<34x144xf32> -> vector<34x144xf32>
    %c1_18 = arith.constant 1 : index
    %c0_19 = arith.constant 0 : index
    %16 = vector.load %arg7[%c1_18, %c0_19] : memref<36x144xf32, #tpu.memory_space<vmem>>, vector<34x144xf32>
    %17 = arith.truncf %16 : vector<34x144xf32> to vector<34x144xbf16>
    %c1_20 = arith.constant 1 : index
    %c0_21 = arith.constant 0 : index
    %c0_22 = arith.constant 0 : index
    %18 = vector.load %arg2[%c1_20, %c0_21, %c0_22] : memref<3x144x144xbf16, #tpu.memory_space<vmem>>, vector<1x144x144xbf16>
    %19 = vector.shape_cast %18 : vector<1x144x144xbf16> to vector<144x144xbf16>
    %cst_23 = arith.constant dense<0.000000e+00> : vector<34x144xf32>
    %20 = tpu.matmul %17, %19, %cst_23 {dimension_numbers = #tpu.dot_dimension_numbers<[1], [0], [0], [1], [0, 0, 1, 1], [], []>} : vector<34x144xbf16>, vector<144x144xbf16>, vector<34x144xf32> -> vector<34x144xf32>
    %21 = arith.addf %15, %20 : vector<34x144xf32>
    %c2 = arith.constant 2 : index
    %c0_24 = arith.constant 0 : index
    %22 = vector.load %arg7[%c2, %c0_24] : memref<36x144xf32, #tpu.memory_space<vmem>>, vector<34x144xf32>
    %23 = arith.truncf %22 : vector<34x144xf32> to vector<34x144xbf16>
    %c2_25 = arith.constant 2 : index
    %c0_26 = arith.constant 0 : index
    %c0_27 = arith.constant 0 : index
    %24 = vector.load %arg2[%c2_25, %c0_26, %c0_27] : memref<3x144x144xbf16, #tpu.memory_space<vmem>>, vector<1x144x144xbf16>
    %25 = vector.shape_cast %24 : vector<1x144x144xbf16> to vector<144x144xbf16>
    %cst_28 = arith.constant dense<0.000000e+00> : vector<34x144xf32>
    %26 = tpu.matmul %23, %25, %cst_28 {dimension_numbers = #tpu.dot_dimension_numbers<[1], [0], [0], [1], [0, 0, 1, 1], [], []>} : vector<34x144xbf16>, vector<144x144xbf16>, vector<34x144xf32> -> vector<34x144xf32>
    %27 = arith.addf %21, %26 : vector<34x144xf32>
    %c0_29 = arith.constant 0 : index
    %c0_30 = arith.constant 0 : index
    %28 = vector.load %arg4[%c0_29, %c0_30] : memref<1x144xf32, #tpu.memory_space<vmem>>, vector<1x144xf32>
    %29 = vector.broadcast %28 : vector<1x144xf32> to vector<34x144xf32>
    %30 = arith.addf %27, %29 : vector<34x144xf32>
    %cst_31 = arith.constant 0.000000e+00 : f32
    %31 = vector.broadcast %cst_31 : f32 to vector<34x144xf32>
    %32 = arith.maximumf %30, %31 : vector<34x144xf32>
    %c1_32 = arith.constant 1 : index
    %c0_33 = arith.constant 0 : index
    %33 = vector.load %arg8[%c1_32, %c0_33] : memref<36x144xf32, #tpu.memory_space<vmem>>, vector<34x144xf32>
    tpu.vector_store %arg8[%c1_32, %c0_33], %32 {strides = array<i32>} : memref<36x144xf32, #tpu.memory_space<vmem>>, vector<34x144xf32>,
    %c0_34 = arith.constant 0 : index
    %c0_35 = arith.constant 0 : index
    %34 = vector.load %arg8[%c0_34, %c0_35] : memref<36x144xf32, #tpu.memory_space<vmem>>, vector<1x144xf32>
    tpu.vector_store %arg8[%c0_34, %c0_35], %0 {strides = array<i32>} : memref<36x144xf32, #tpu.memory_space<vmem>>, vector<1x144xf32>,
    %c17_36 = arith.constant 17 : index
    %c0_37 = arith.constant 0 : index
    %35 = vector.load %arg8[%c17_36, %c0_37] : memref<36x144xf32, #tpu.memory_space<vmem>>, vector<1x144xf32>
    tpu.vector_store %arg8[%c17_36, %c0_37], %0 {strides = array<i32>} : memref<36x144xf32, #tpu.memory_space<vmem>>, vector<1x144xf32>,
    %c18_38 = arith.constant 18 : index
    %c0_39 = arith.constant 0 : index
    %36 = vector.load %arg8[%c18_38, %c0_39] : memref<36x144xf32, #tpu.memory_space<vmem>>, vector<1x144xf32>
    tpu.vector_store %arg8[%c18_38, %c0_39], %0 {strides = array<i32>} : memref<36x144xf32, #tpu.memory_space<vmem>>, vector<1x144xf32>,
    %c35_40 = arith.constant 35 : index
    %c0_41 = arith.constant 0 : index
    %37 = vector.load %arg8[%c35_40, %c0_41] : memref<36x144xf32, #tpu.memory_space<vmem>>, vector<1x144xf32>
    tpu.vector_store %arg8[%c35_40, %c0_41], %0 {strides = array<i32>} : memref<36x144xf32, #tpu.memory_space<vmem>>, vector<1x144xf32>,
    %c0_42 = arith.constant 0 : index
    %c0_43 = arith.constant 0 : index
    %38 = vector.load %arg8[%c0_42, %c0_43] : memref<36x144xf32, #tpu.memory_space<vmem>>, vector<34x144xf32>
    %39 = arith.truncf %38 : vector<34x144xf32> to vector<34x144xbf16>
    %c0_44 = arith.constant 0 : index
    %c0_45 = arith.constant 0 : index
    %c0_46 = arith.constant 0 : index
    %40 = vector.load %arg3[%c0_44, %c0_45, %c0_46] : memref<3x144x144xbf16, #tpu.memory_space<vmem>>, vector<1x144x144xbf16>
    %41 = vector.shape_cast %40 : vector<1x144x144xbf16> to vector<144x144xbf16>
    %cst_47 = arith.constant dense<0.000000e+00> : vector<34x144xf32>
    %42 = tpu.matmul %39, %41, %cst_47 {dimension_numbers = #tpu.dot_dimension_numbers<[1], [0], [0], [1], [0, 0, 1, 1], [], []>} : vector<34x144xbf16>, vector<144x144xbf16>, vector<34x144xf32> -> vector<34x144xf32>
    %c1_48 = arith.constant 1 : index
    %c0_49 = arith.constant 0 : index
    %43 = vector.load %arg8[%c1_48, %c0_49] : memref<36x144xf32, #tpu.memory_space<vmem>>, vector<34x144xf32>
    %44 = arith.truncf %43 : vector<34x144xf32> to vector<34x144xbf16>
    %c1_50 = arith.constant 1 : index
    %c0_51 = arith.constant 0 : index
    %c0_52 = arith.constant 0 : index
    %45 = vector.load %arg3[%c1_50, %c0_51, %c0_52] : memref<3x144x144xbf16, #tpu.memory_space<vmem>>, vector<1x144x144xbf16>
    %46 = vector.shape_cast %45 : vector<1x144x144xbf16> to vector<144x144xbf16>
    %cst_53 = arith.constant dense<0.000000e+00> : vector<34x144xf32>
    %47 = tpu.matmul %44, %46, %cst_53 {dimension_numbers = #tpu.dot_dimension_numbers<[1], [0], [0], [1], [0, 0, 1, 1], [], []>} : vector<34x144xbf16>, vector<144x144xbf16>, vector<34x144xf32> -> vector<34x144xf32>
    %48 = arith.addf %42, %47 : vector<34x144xf32>
    %c2_54 = arith.constant 2 : index
    %c0_55 = arith.constant 0 : index
    %49 = vector.load %arg8[%c2_54, %c0_55] : memref<36x144xf32, #tpu.memory_space<vmem>>, vector<34x144xf32>
    %50 = arith.truncf %49 : vector<34x144xf32> to vector<34x144xbf16>
    %c2_56 = arith.constant 2 : index
    %c0_57 = arith.constant 0 : index
    %c0_58 = arith.constant 0 : index
    %51 = vector.load %arg3[%c2_56, %c0_57, %c0_58] : memref<3x144x144xbf16, #tpu.memory_space<vmem>>, vector<1x144x144xbf16>
    %52 = vector.shape_cast %51 : vector<1x144x144xbf16> to vector<144x144xbf16>
    %cst_59 = arith.constant dense<0.000000e+00> : vector<34x144xf32>
    %53 = tpu.matmul %50, %52, %cst_59 {dimension_numbers = #tpu.dot_dimension_numbers<[1], [0], [0], [1], [0, 0, 1, 1], [], []>} : vector<34x144xbf16>, vector<144x144xbf16>, vector<34x144xf32> -> vector<34x144xf32>
    %54 = arith.addf %48, %53 : vector<34x144xf32>
    %c0_60 = arith.constant 0 : index
    %c0_61 = arith.constant 0 : index
    %55 = vector.load %arg5[%c0_60, %c0_61] : memref<1x144xf32, #tpu.memory_space<vmem>>, vector<1x144xf32>
    %56 = vector.broadcast %55 : vector<1x144xf32> to vector<34x144xf32>
    %57 = arith.addf %54, %56 : vector<34x144xf32>
    %c0_62 = arith.constant 0 : index
    %c0_63 = arith.constant 0 : index
    %c0_64 = arith.constant 0 : index
    %58 = vector.load %arg1[%c0_62, %c0_63, %c0_64] : memref<2x16x144xf32, #tpu.memory_space<vmem>>, vector<1x16x144xf32>
    %59 = vector.shape_cast %58 : vector<1x16x144xf32> to vector<16x144xf32>
    %60 = vector.extract_strided_slice %57 {offsets = [0, 0], sizes = [16, 144], strides = [1, 1]} : vector<34x144xf32> to vector<16x144xf32>
    %61 = arith.addf %59, %60 : vector<16x144xf32>
    %cst_65 = arith.constant 0.000000e+00 : f32
    %62 = vector.broadcast %cst_65 : f32 to vector<16x144xf32>
    %63 = arith.maximumf %61, %62 : vector<16x144xf32>
    %c0_66 = arith.constant 0 : index
    %c0_67 = arith.constant 0 : index
    %c0_68 = arith.constant 0 : index
    %64 = vector.load %arg6[%c0_66, %c0_67, %c0_68] : memref<2x16x144xf32, #tpu.memory_space<vmem>>, vector<1x16x144xf32>
    %65 = vector.shape_cast %64 : vector<1x16x144xf32> to vector<16x144xf32>
    %66 = vector.shape_cast %63 : vector<16x144xf32> to vector<1x16x144xf32>
    tpu.vector_store %arg6[%c0_66, %c0_67, %c0_68], %66 {strides = array<i32>} : memref<2x16x144xf32, #tpu.memory_space<vmem>>, vector<1x16x144xf32>,
    %c1_69 = arith.constant 1 : index
    %c0_70 = arith.constant 0 : index
    %c0_71 = arith.constant 0 : index
    %67 = vector.load %arg1[%c1_69, %c0_70, %c0_71] : memref<2x16x144xf32, #tpu.memory_space<vmem>>, vector<1x16x144xf32>
    %68 = vector.shape_cast %67 : vector<1x16x144xf32> to vector<16x144xf32>
    %69 = vector.extract_strided_slice %57 {offsets = [18, 0], sizes = [16, 144], strides = [1, 1]} : vector<34x144xf32> to vector<16x144xf32>
    %70 = arith.addf %68, %69 : vector<16x144xf32>
    %cst_72 = arith.constant 0.000000e+00 : f32
    %71 = vector.broadcast %cst_72 : f32 to vector<16x144xf32>
    %72 = arith.maximumf %70, %71 : vector<16x144xf32>
    %c1_73 = arith.constant 1 : index
    %c0_74 = arith.constant 0 : index
    %c0_75 = arith.constant 0 : index
    %73 = vector.load %arg6[%c1_73, %c0_74, %c0_75] : memref<2x16x144xf32, #tpu.memory_space<vmem>>, vector<1x16x144xf32>
    %74 = vector.shape_cast %73 : vector<1x16x144xf32> to vector<16x144xf32>
    %75 = vector.shape_cast %72 : vector<16x144xf32> to vector<1x16x144xf32>
    tpu.vector_store %arg6[%c1_73, %c0_74, %c0_75], %75 {strides = array<i32>} : memref<2x16x144xf32, #tpu.memory_space<vmem>>, vector<1x16x144xf32>,
    return
  }
  func.func @transform_0(%arg0: i32) -> (i32, i32, i32) {
    %c0_i32 = arith.constant 0 : i32
    %c0_i32_0 = arith.constant 0 : i32
    %c0_i32_1 = arith.constant 0 : i32
    return %arg0, %c0_i32, %c0_i32_0 : i32, i32, i32
  }
  func.func @transform_1(%arg0: i32) -> (i32, i32, i32) {
    %c0_i32 = arith.constant 0 : i32
    %c0_i32_0 = arith.constant 0 : i32
    %c0_i32_1 = arith.constant 0 : i32
    %c0_i32_2 = arith.constant 0 : i32
    return %c0_i32, %c0_i32_0, %c0_i32_1 : i32, i32, i32
  }
  func.func @transform_2(%arg0: i32) -> (i32, i32, i32) {
    %c0_i32 = arith.constant 0 : i32
    %c0_i32_0 = arith.constant 0 : i32
    %c0_i32_1 = arith.constant 0 : i32
    %c0_i32_2 = arith.constant 0 : i32
    return %c0_i32, %c0_i32_0, %c0_i32_1 : i32, i32, i32
  }
  func.func @transform_3(%arg0: i32) -> (i32, i32) {
    %c0_i32 = arith.constant 0 : i32
    %c0_i32_0 = arith.constant 0 : i32
    %c0_i32_1 = arith.constant 0 : i32
    return %c0_i32, %c0_i32_0 : i32, i32
  }
  func.func @transform_4(%arg0: i32) -> (i32, i32) {
    %c0_i32 = arith.constant 0 : i32
    %c0_i32_0 = arith.constant 0 : i32
    %c0_i32_1 = arith.constant 0 : i32
    return %c0_i32, %c0_i32_0 : i32, i32
  }
  func.func @transform_5(%arg0: i32) -> (i32, i32, i32) {
    %c0_i32 = arith.constant 0 : i32
    %c0_i32_0 = arith.constant 0 : i32
    %c0_i32_1 = arith.constant 0 : i32
    return %arg0, %c0_i32, %c0_i32_0 : i32, i32, i32
  }
}

</mosaic_0001>

<bundles_post_ra>
// kernel: resblock_forward.1
= control target key start
LH: loop header
LB: loop body
LE: loop exit
PB: predicated region body
PF: predicated region fallthrough
CT: control target
= control target key end

     0   :  { %v21_v0 = vlaneseq  ;;  %v1962_v5 = vmov 0.0   ;;  %vm38_vm1 = vcmask 1040384   ;;  %vm52_vm2 = vcmask 130049   ;;  %s2565_s1 = inlined_call_operand.vmem [shape: bf16[3,144,144], index: 1, kind: input, shape index: {}]   ;;  %s2566_s0 = inlined_call_operand.vmem [shape: f32[2,16,144], index: 0, kind: input, shape index: {}]   ;;  %s2567_s2 = inlined_call_operand.vmem [shape: bf16[3,144,144], index: 2, kind: input, shape index: {}]   ;;  %s2568_s3 = inlined_call_operand.vmem [shape: f32[1,144], index: 3, kind: input, shape index: {}]   ;;  %s2569_s4 = inlined_call_operand.vmem [shape: f32[1,144], index: 4, kind: input, shape index: {}]   ;;  %s2570_s5 = inlined_call_operand.vmem [shape: f32[2,16,144], index: 5, kind: output, shape index: {}]  }
   0x1   :  { %v1802_v1 = vld [vmem:[%s2565_s1 + $0x94] ss:$8 sps:$4 sm:$0xff]   ;;  %v1804_v2 = vld [vmem:[%s2565_s1 + $0x90] ss:$8 sps:$4 sm:$0xff]   ;;  %v1805_v4 = vld [vmem:[%s2565_s1 + $0xa4] ss:$8 sps:$4 sm:$0xff]  }
   0x2   :  { %vm2000_vm0 = vcmp.lt.s32.totalorder %v21_v0, 144  ;;  %306 = vmatprep.subr.bf16.mxu0 %v1802_v1  ;;  %v1807_v6 = vld [vmem:[%s2565_s1 + $0xa0] ss:$8 sps:$4 sm:$0xff]   ;;  %v1808_v7 = vld [vmem:[%s2565_s1 + $0xb4] ss:$8 sps:$4 sm:$0xff]   ;;  %vm55_vm3 = vcmask 130048  }
   0x3   :  { %28 = vst.msk [vmem:[#allocation2 + $0x21] ss:$8 sm:$0x3] %vm2000_vm0, %v1962_v5  ;;  %61 = vst.msk [vmem:[#allocation2 + $0x22] ss:$8 sm:$0x3] %vm2000_vm0, %v1962_v5  ;;  %307 = vmatpush1.bf16.msra.mxu0 %v1804_v2 }
   0x4   :  { %25 = vst.msk [vmem:[#allocation2] ss:$8 sm:$0x3] %vm2000_vm0, %v1962_v5  ;;  %64 = vst.msk [vmem:[#allocation2 + $0x43] ss:$8 sm:$0x3] %vm2000_vm0, %v1962_v5  ;;  %308 = vmatprep.subr.bf16.mxu0 %v1805_v4 }
   0x5   :  { %823 = vst.msk [vmem:[#allocation3] ss:$8 sm:$0x3] %vm2000_vm0, %v1962_v5  ;;  %832 = vst.msk [vmem:[#allocation3 + $0x43] ss:$8 sm:$0x3] %vm2000_vm0, %v1962_v5 }
   0x6   :  { %v1810_v8 = vld [vmem:[%s2565_s1 + $0xb0] ss:$8 sps:$4 sm:$0xff]   ;;  %v1811_v9 = vld [vmem:[%s2565_s1 + $0xc4] ss:$8 sps:$4 sm:$0xff]   ;;  %v1813_v10 = vld [vmem:[%s2565_s1 + $0xc0] ss:$8 sps:$4 sm:$0xff]  }
   0x7   :  { %309 = vmatpush1.bf16.msra.mxu0 %v1807_v6  ;;  %v1814_v11 = vld [vmem:[%s2565_s1 + $0xd4] ss:$8 sps:$4 sm:$0xff]   ;;  %vm58_vm4 = vcmask 122880   ;;  %v31_v12 = vld [vmem:[%s2566_s0 + $0x8] sm:$0xff]  ;;  %vm75_vm5 = vcmask 1042432   ;;  %vm89_vm6 = vcmask 130051  }
   0x8   :  { %310 = vmatprep.subr.bf16.mxu0 %v1808_v7  ;;  %v33_v13 = vld [vmem:[%s2566_s0 + $0x18] sm:$0xff]  ;;  %v1560_v14 = vld [vmem:[%s2566_s0 + $0x28] sm:$0xff]  ;;  %vm94_vm7 = vcmask 124928   ;;  %v40_v15 = vrot.slane %v31_v12, 7  ;;  %v30_v22 = vld [vmem:[%s2566_s0] sm:$0xff]  ;;  %vm559_vm9 = vcmask 1046528  }
   0x9   :  { %v43_v16 = vrot.slane %v33_v13, 7  ;;  %v1562_v17 = vld [vmem:[%s2566_s0 + $0x38] sm:$0xff]  ;;  %v77_v18 = vrot.slane %v1560_v14, 5  ;;  %v1817_v20 = vld [vmem:[%s2565_s1 + $0xe4] ss:$8 sps:$4 sm:$0xff]   ;;  %v32_v24 = vld [vmem:[%s2566_s0 + $0x10] sm:$0xff] }
   0xa   :  { %v1816_v19 = vld [vmem:[%s2565_s1 + $0xd0] ss:$8 sps:$4 sm:$0xff]   ;;  %v80_v21 = vrot.slane %v1562_v17, 5  ;;  %53 = vst.msk [vmem:[#allocation2 + $0x8] sm:$0xfe] %vm52_vm2, %v40_v15  ;;  %v39_v25 = vrot.slane %v30_v22, 7 }
   0xb   :  { %311 = vmatpush1.bf16.msra.mxu0 %v1810_v8  ;;  %v44_v23 = vsel %vm38_vm1, %v40_v15, %v43_v16  ;;  %59 = vst.msk [vmem:[#allocation2 + $0x28] sm:$0x1] %vm58_vm4, %v43_v16  ;;  %v1559_v26 = vld [vmem:[%s2566_s0 + $0x20] sm:$0xff]  ;;  %v1561_v27 = vld [vmem:[%s2566_s0 + $0x30] sm:$0xff]  ;;  %v41_v29 = vrot.slane %v32_v24, 7  ;;  %vm1527_vm10 = vcmask 1045504  }
   0xc   :  { %312 = vmatprep.subr.bf16.mxu0 %v1811_v9  ;;  %90 = vst.msk [vmem:[#allocation2 + $0x28] sm:$0xf8] %vm89_vm6, %v77_v18  ;;  %v81_v28 = vsel %vm75_vm5, %v77_v18, %v80_v21  ;;  %v76_v30 = vrot.slane %v1559_v26, 5  ;;  %v78_v31 = vrot.slane %v1561_v27, 5  ;;  %51 = vst [vmem:[#allocation2] sm:$0xfe] %v39_v25 }
   0xd   :  { %56 = vst.msk [vmem:[#allocation2 + $0x18] sm:$0xff] %vm55_vm3, %v44_v23  ;;  %92 = vst.msk [vmem:[#allocation2 + $0x38] sm:$0xff] %vm55_vm3, %v81_v28  ;;  %v2081_v32 = vsel %vm38_vm1, %v39_v25, %v41_v29  ;;  %v1819_v34 = vld [vmem:[%s2565_s1 + $0xe0] ss:$8 sps:$4 sm:$0xff]   ;;  %v1820_v35 = vld [vmem:[%s2565_s1 + $0xf4] ss:$8 sps:$4 sm:$0xff]  }
   0xe   :  { %95 = vst.msk [vmem:[#allocation2 + $0x48] sm:$0x7] %vm94_vm7, %v80_v21  ;;  %57 = vst [vmem:[#allocation2 + $0x20] sm:$0x1] %v41_v29  ;;  %v79_v33 = vsel %vm75_vm5, %v76_v30, %v78_v31  ;;  %v1822_v36 = vld [vmem:[%s2565_s1 + $0xf0] ss:$8 sps:$4 sm:$0xff]  }
   0xf   :  { %313 = vmatpush1.bf16.msra.mxu0 %v1813_v10  ;;  %88 = vst [vmem:[#allocation2 + $0x20] sm:$0xf8] %v76_v30  ;;  %93 = vst [vmem:[#allocation2 + $0x40] sm:$0x7] %v78_v31  ;;  %v1823_v39 = vld [vmem:[%s2565_s1 + $0x104] ss:$8 sps:$4 sm:$0xff]  }
  0x10   :  { %314 = vmatprep.subr.bf16.mxu0 %v1814_v11  ;;  %v1825_v46 = vld [vmem:[%s2565_s1 + $0x100] ss:$8 sps:$4 sm:$0xff]   ;;  %v1826_v50 = vld [vmem:[%s2565_s1 + $0x114] ss:$8 sps:$4 sm:$0xff]   ;;  %vm157_vm8 = vsmask.f32 7424 }
  0x11   :  { %v131_v38 = vld [vmem:[#allocation2 + $0x8] sm:$0xfe]  ;;  %v1828_v2 = vld [vmem:[%s2565_s1 + $0x110] ss:$8 sps:$4 sm:$0xff]   ;;  %v1834_v16 = vld [vmem:[%s2565_s1 + $0x14] ss:$8 sps:$4 sm:$0xff]  }
  0x12   :  { %v1831_v10 = vld [vmem:[%s2565_s1 + $0x4] ss:$8 sps:$4 sm:$0xff]   ;;  %v1829_v12 = vld [vmem:[%s2565_s1] ss:$8 sps:$4 sm:$0xff]   ;;  %v1832_v18 = vld [vmem:[%s2565_s1 + $0x10] ss:$8 sps:$4 sm:$0xff]  }
  0x13   :  { %315 = vmatpush1.bf16.msra.mxu0 %v1816_v19  ;;  %v101_v37 = vld [vmem:[#allocation2 + $0x28] sm:$0xff]  ;;  %v130_v44 = vld [vmem:[#allocation2] sm:$0xfe]  ;;  %v1840_v26 = vld [vmem:[%s2565_s1 + $0x34] ss:$8 sps:$4 sm:$0xff]  }
  0x14   :  { %316 = vmatprep.subr.bf16.mxu0 %v1817_v20  ;;  %v2096_v40 = vld [vmem:[#allocation2 + $0x18] sm:$0xff]  ;;  %v134_v49 = vpack.c.bf16 %v2081_v32, %v130_v44  ;;  %v1837_v22 = vld [vmem:[%s2565_s1 + $0x24] ss:$8 sps:$4 sm:$0xff]   ;;  %v1835_v23 = vld [vmem:[%s2565_s1 + $0x20] ss:$8 sps:$4 sm:$0xff]  }
  0x15   :  { %v133_v41 = vld [vmem:[#allocation2 + $0x48] sm:$0x7]  ;;  %v103_v42 = vld [vmem:[#allocation2 + $0x38] sm:$0xff]  ;;  %v135_v43 = vpack.c.bf16 %v2096_v40, %v131_v38  ;;  %v526_v27 = vld [vmem:[#allocation2] sm:$0xfc] }
  0x16   :  { %v137_v45 = vpack.c.bf16 %v133_v41, %v133_v41  ;;  %v2102_v47 = vpack.c.bf16 %v103_v42, %v101_v37  ;;  %v100_v48 = vld [vmem:[#allocation2 + $0x20] sm:$0xff]  ;;  %v159_v55 = vshrl.u32 %v134_v49, 16  ;;  %v161_v56 = vshll.u32 %v134_v49, 16  ;;  %v1838_v31 = vld [vmem:[%s2565_s1 + $0x30] ss:$8 sps:$4 sm:$0xff]  }
  0x17   :  { %317 = vmatpush1.bf16.msra.mxu0 %v1819_v34  ;;  %v171_v51 = vshrl.u32 %v135_v43, 16  ;;  %v173_v52 = vshll.u32 %v135_v43, 16  ;;  %v2108_v53 = vpack.c.bf16 %v79_v33, %v100_v48  ;;  %v132_v57 = vld [vmem:[#allocation2 + $0x40] sm:$0x7]  ;;  %v530_v29 = vpack.c.bf16 %v2081_v32, %v526_v27  ;;  %v1843_v33 = vld [vmem:[%s2565_s1 + $0x44] ss:$8 sps:$4 sm:$0xff]  }
  0x18   :  { %318 = vmatprep.subr.bf16.mxu0 %v1820_v35  ;;  %v178_v54 = vshll.u32 %v2102_v47, 16  ;;  %v190_v59 = vshrl.u32 %v2102_v47, 16  ;;  %v194_v61 = vshll.u32 %v137_v45, 16  ;;  %v163_v63 = vrot.slane %v161_v56, 1  ;;  %v97_v34 = vld [vmem:[#allocation2 + $0x8] sm:$0xff] }
  0x19   :  { %v175_v58 = vrot.slane %v173_v52, 1  ;;  %v166_v60 = vshll.u32 %v2108_v53, 16  ;;  %v136_v7 = vpack.c.bf16 %v132_v57, %v132_v57  ;;  %v182_v14 = vshrl.u32 %v2108_v53, 16  ;;  %v1841_v38 = vld [vmem:[%s2565_s1 + $0x40] ss:$8 sps:$4 sm:$0xff]  }
  0x1a   :  { %v180_v62 = vrot.slane %v178_v54, 1  ;;  %v164_v4 = vor.u32 %v163_v63, %v159_v55  ;;  %v196_v11 = vrot.slane %v194_v61, 1  ;;  %v201_v21 = vshrl.u32 %v137_v45, 16  ;;  %v1846_v41 = vld [vmem:[%s2565_s1 + $0x54] ss:$8 sps:$4 sm:$0xff]  }
  0x1b   :  { %319 = vmatpush1.bf16.msra.mxu0 %v1822_v36  ;;  %v176_v1 = vor.u32 %v175_v58, %v171_v51  ;;  %v168_v6 = vrot.slane %v166_v60, 1  ;;  %v186_v15 = vshll.u32 %v136_v7, 16  ;;  %v198_v28 = vshrl.u32 %v136_v7, 16  ;;  %v1844_v42 = vld [vmem:[%s2565_s1 + $0x50] ss:$8 sps:$4 sm:$0xff]  }
  0x1c   :  { %320 = vmatprep.subr.bf16.mxu0 %v1823_v39  ;;  %v192_v9 = vor.u32 %v190_v59, %v180_v62  ;;  %v203_v25 = vor.u32 %v201_v21, %v196_v11  ;;  %v561_v30 = vrot.slane %v2108_v53, 1  ;;  %v560_v35 = vrot.slane %v530_v29, 1  ;;  %v1849_v43 = vld [vmem:[%s2565_s1 + $0x64] ss:$8 sps:$4 sm:$0xff]   ;;  %v1847_v44 = vld [vmem:[%s2565_s1 + $0x60] ss:$8 sps:$4 sm:$0xff]  }
  0x1d   :  { %v181_v8 = vsel %vm157_vm8, %v176_v1, %v180_v62  ;;  %v169_v13 = vsel %vm157_vm8, %v164_v4, %v168_v6  ;;  %v184_v19 = vor.u32 %v182_v14, %v168_v6  ;;  %v188_v20 = vrot.slane %v186_v15, 1  ;;  %v1852_v45 = vld [vmem:[%s2565_s1 + $0x74] ss:$8 sps:$4 sm:$0xff]   ;;  %v1855_v48 = vld [vmem:[%s2565_s1 + $0x84] ss:$8 sps:$4 sm:$0xff]  }
  0x1e   :  { %1599 = vmatprep.mubr.msk.bf16.mxu0 %vm55_vm3, %v181_v8  ;;  %v197_v17 = vsel %vm157_vm8, %v192_v9, %v196_v11  ;;  %v2156_v37 = vsel %vm559_vm9, %v560_v35, %v561_v30  ;;  %v107_v39 = vpack.c.bf16 %v2096_v40, %v97_v34  ;;  %v1853_v49 = vld [vmem:[%s2565_s1 + $0x80] ss:$8 sps:$4 sm:$0xff]   ;;  %v1858_v51 = vld [vmem:[%s2565_s1 + $0x124] ss:$8 sps:$4 sm:$0xff]   ;;  %v1861_v55 = vld [vmem:[%s2565_s1 + $0x134] ss:$8 sps:$4 sm:$0xff]  }
  0x1f   :  { %321 = vmatpush1.bf16.msra.mxu0 %v1825_v46  ;;  %v189_v24 = vsel %vm157_vm8, %v184_v19, %v188_v20  ;;  %v200_v36 = vor.u32 %v198_v28, %v188_v20  ;;  %v1850_v46 = vld [vmem:[%s2565_s1 + $0x70] ss:$8 sps:$4 sm:$0xff]   ;;  %v1856_v54 = vld [vmem:[%s2565_s1 + $0x120] ss:$8 sps:$4 sm:$0xff]   ;;  %v1867_v61 = vld [vmem:[%s2565_s1 + $0x154] ss:$8 sps:$4 sm:$0xff]  }
  0x20   :  { %322 = vmatprep.subr.bf16.mxu0 %v1826_v50  ;;  %v96_v50 = vld [vmem:[#allocation2] sm:$0xff]  ;;  %v1859_v56 = vld [vmem:[%s2565_s1 + $0x130] ss:$8 sps:$4 sm:$0xff]   ;;  %v105_v57 = vld [vmem:[#allocation2 + $0x48] sm:$0x3]  ;;  %v564_v6 = vrot.slane %v2102_v47, 1 }
  0x21   :  { %v106_v52 = vpack.c.bf16 %v2081_v32, %v96_v50  ;;  %v1864_v32 = vld [vmem:[%s2565_s1 + $0x144] ss:$8 sps:$4 sm:$0xff]   ;;  %v1862_v59 = vld [vmem:[%s2565_s1 + $0x140] ss:$8 sps:$4 sm:$0xff]   ;;  %v111_v60 = vpack.c.bf16 %v105_v57, %v105_v57  ;;  %v1865_v63 = vld [vmem:[%s2565_s1 + $0x150] ss:$8 sps:$4 sm:$0xff]  }
  0x22   :  { %v527_v58 = vld [vmem:[#allocation2 + $0x8] sm:$0xfc]  ;;  %v104_v1 = vld [vmem:[#allocation2 + $0x40] sm:$0x3]  ;;  %v1873_v8 = vld [vmem:[%s2565_s1 + $0x174] ss:$8 sps:$4 sm:$0xff]  }
  0x23   :  { %323 = vmatpush1.bf16.msra.mxu0 %v1828_v2  ;;  %v531_v62 = vpack.c.bf16 %v2096_v40, %v527_v58  ;;  %v1870_v2 = vld [vmem:[%s2565_s1 + $0x164] ss:$8 sps:$4 sm:$0xff]   ;;  %v110_v7 = vpack.c.bf16 %v104_v1, %v104_v1  ;;  %v1868_v40 = vld [vmem:[%s2565_s1 + $0x160] ss:$8 sps:$4 sm:$0xff]   ;;  %v1877_v14 = vld [vmem:[%s2565_s1 + $0x190] ss:$8 sps:$4 sm:$0xff]  }
  0x24   :  { %465 = vmatprep.subr.bf16.mxu0 %v1831_v10  ;;  %v1871_v10 = vld [vmem:[%s2565_s1 + $0x170] ss:$8 sps:$4 sm:$0xff]   ;;  %v1874_v11 = vld [vmem:[%s2565_s1 + $0x180] ss:$8 sps:$4 sm:$0xff]   ;;  %v1882_v15 = vld [vmem:[%s2565_s1 + $0x1a4] ss:$8 sps:$4 sm:$0xff]  }
  0x25   :  { %v563_v4 = vrot.slane %v531_v62, 1  ;;  %v528_v19 = vld [vmem:[#allocation2 + $0x40] sm:$0xf]  ;;  %v1886_v27 = vld [vmem:[%s2567_s2 + $0xa4] ss:$8 sps:$4 sm:$0xff]  }
  0x26   :  { %339 = vmatmul.mubr.bf16.vlgmr.msra.gmra.mrb[0].mxu0 %v169_v13  ;;  %v529_v13 = vld [vmem:[#allocation2 + $0x48] sm:$0xf]  ;;  %v532_v20 = vpack.c.bf16 %v528_v19, %v528_v19  ;;  %v1888_v29 = vld [vmem:[%s2567_s2 + $0xb4] ss:$8 sps:$4 sm:$0xff]   ;;  %v1891_v34 = vld [vmem:[%s2567_s2 + $0xc4] ss:$8 sps:$4 sm:$0xff]  }
  0x27   :  { %466 = vmatpush1.bf16.msra.mxu0 %v1829_v12  ;;  %1600 = vmatprep.mubr.msk.bf16.mxu0 %vm55_vm3, %v197_v17  ;;  %v565_v9 = vsel %vm559_vm9, %v563_v4, %v564_v6  ;;  %v1879_v12 = vld [vmem:[%s2565_s1 + $0x194] ss:$8 sps:$4 sm:$0xff]   ;;  %v1880_v17 = vld [vmem:[%s2565_s1 + $0x1a0] ss:$8 sps:$4 sm:$0xff]  }
  0x28   :  { %467 = vmatprep.subr.bf16.mxu0 %v1834_v16  ;;  %v533_v16 = vpack.c.bf16 %v529_v13, %v529_v13 }
  0x2b   :  { %468 = vmatpush1.bf16.msra.mxu0 %v1832_v18  ;;  %v568_v18 = vrot.slane %v533_v16, 1 }
  0x2c   :  { %469 = vmatprep.subr.bf16.mxu0 %v1837_v22  ;;  %v566_v22 = vrot.slane %v532_v20, 1 }
  0x2d   :  { %v569_v21 = vsel %vm559_vm9, %v564_v6, %v568_v18 }
  0x2e   :  { %349 = vmatmul.mubr.bf16.gmra.mrb[4].mxu0 %v189_v24  ;;  %v1883_v24 = vld [vmem:[%s2567_s2 + $0x94] ss:$8 sps:$4 sm:$0xff]  }
  0x2f   :  { %470 = vmatpush1.bf16.msra.mxu0 %v1835_v23  ;;  %1601 = vmatprep.mubr.msk.bf16.mxu0 %vm55_vm3, %v203_v25  ;;  %v567_v23 = vsel %vm559_vm9, %v561_v30, %v566_v22  ;;  %v1885_v25 = vld [vmem:[%s2567_s2 + $0x90] ss:$8 sps:$4 sm:$0xff]  }
  0x30   :  { %471 = vmatprep.subr.bf16.mxu0 %v1840_v26  ;;  %1043 = vmatprep.subr.bf16.mxu1 %v1883_v24  ;;  %v1665_v26 = vld [vmem:[%s2567_s2 + $0xa8] sm:$0xff]  ;;  %v1890_v30 = vld [vmem:[%s2567_s2 + $0xb0] ss:$8 sps:$4 sm:$0xff]  }
  0x31   :  { %1044 = vmatpush1.bf16.msra.mxu1 %v1885_v25 }
  0x32   :  { %1045 = vmatprep.subr.bf16.mxu1 %v1886_v27 }
  0x33   :  { %472 = vmatpush1.bf16.msra.mxu0 %v1838_v31  ;;  %v1668_v31 = vld [vmem:[%s2567_s2 + $0xc0] sm:$0xff] }
  0x34   :  { %473 = vmatprep.subr.bf16.mxu0 %v1843_v33  ;;  %v1669_v33 = vld [vmem:[%s2567_s2 + $0xc8] sm:$0xff] }
  0x35   :  { %v1686_v35 = vcombine.low %v1668_v31, %v1669_v33 }
  0x36   :  { %359 = vmatmul.mubr.bf16.gmra.mrb[8].mxu0 %v200_v36  ;;  %v1893_v36 = vld [vmem:[%s2567_s2 + $0xd4] ss:$8 sps:$4 sm:$0xff]  }
  0x37   :  { %474 = vmatpush1.bf16.msra.mxu0 %v1841_v38  ;;  %1620 = vmatprep.mubr.msk.bf16.mxu0 %vm55_vm3, %v107_v39  ;;  %v1896_v38 = vld [vmem:[%s2567_s2 + $0xe4] ss:$8 sps:$4 sm:$0xff]   ;;  %v1898_v39 = vld [vmem:[%s2567_s2 + $0xe0] ss:$8 sps:$4 sm:$0xff]  }
  0x38   :  { %475 = vmatprep.subr.bf16.mxu0 %v1846_v41  ;;  %v1899_v41 = vld [vmem:[%s2567_s2 + $0xf4] ss:$8 sps:$4 sm:$0xff]  }
  0x3b   :  { %476 = vmatpush1.bf16.msra.mxu0 %v1844_v42  ;;  %v1901_v42 = vld [vmem:[%s2567_s2 + $0xf0] ss:$8 sps:$4 sm:$0xff]  }
  0x3c   :  { %477 = vmatprep.subr.bf16.mxu0 %v1849_v43  ;;  %v1902_v43 = vld [vmem:[%s2567_s2 + $0x104] ss:$8 sps:$4 sm:$0xff]  }
  0x3f   :  { %478 = vmatpush1.bf16.msra.mxu0 %v1847_v44  ;;  %v1904_v44 = vld [vmem:[%s2567_s2 + $0x100] ss:$8 sps:$4 sm:$0xff]  }
  0x40   :  { %479 = vmatprep.subr.bf16.mxu0 %v1852_v45  ;;  %v1905_v45 = vld [vmem:[%s2567_s2 + $0x114] ss:$8 sps:$4 sm:$0xff]  }
  0x43   :  { %480 = vmatpush1.bf16.msra.mxu0 %v1850_v46  ;;  %v1907_v46 = vld [vmem:[%s2567_s2 + $0x110] ss:$8 sps:$4 sm:$0xff]  }
  0x44   :  { %481 = vmatprep.subr.bf16.mxu0 %v1855_v48  ;;  %v1910_v48 = vld [vmem:[%s2567_s2 + $0x4] ss:$8 sps:$4 sm:$0xff]  }
  0x47   :  { %482 = vmatpush1.bf16.msra.mxu0 %v1853_v49 }
  0x48   :  { %672 = vmatprep.subr.bf16.mxu0 %v1858_v51 }
  0x4a   :  { %498 = vmatmul.mubr.bf16.vlgmr.msra.gmra.mrb[0].mxu0 %v106_v52 }
  0x4b   :  { %673 = vmatpush1.bf16.msra.mxu0 %v1856_v54  ;;  %1621 = vmatprep.mubr.msk.bf16.mxu0 %vm55_vm3, %v2102_v47  ;;  %v1876_v47 = vld [vmem:[%s2565_s1 + $0x184] ss:$8 sps:$4 sm:$0xff]  }
  0x4c   :  { %674 = vmatprep.subr.bf16.mxu0 %v1861_v55 }
  0x4f   :  { %675 = vmatpush1.bf16.msra.mxu0 %v1859_v56 }
  0x50   :  { %676 = vmatprep.subr.bf16.mxu0 %v1864_v32 }
  0x52   :  { %508 = vmatmul.mubr.bf16.gmra.mrb[4].mxu0 %v2108_v53  ;;  %v1664_v53 = vld [vmem:[%s2567_s2 + $0xa0] sm:$0xff] }
  0x53   :  { %677 = vmatpush1.bf16.msra.mxu0 %v1862_v59  ;;  %1622 = vmatprep.mubr.msk.bf16.mxu0 %vm55_vm3, %v111_v60  ;;  %v1682_v28 = vcombine.low %v1664_v53, %v1665_v26  ;;  %v2321_v59 = vshrl.u32 %v21_v0, 7 }
  0x54   :  { %678 = vmatprep.subr.bf16.mxu0 %v1867_v61  ;;  %v743_v61 = vld [vmem:[%s2568_s3] sm:$0x3] }
  0x55   :  { %1046 = vmatpush1.bf16.msra.mxu1 %v1682_v28  ;;  %v747_v60 = vsub.s32 0, %v2321_v59  ;;  %v751_v62 = vsub.s32 1, %v2321_v59 }
  0x56   :  { %1047 = vmatprep.subr.bf16.mxu1 %v1888_v29 }
  0x57   :  { %679 = vmatpush1.bf16.msra.mxu0 %v1865_v63  ;;  %v748_v63 = vrot.slane %v743_v61, %v747_v60  ;;  %v752_v1 = vrot.slane %v743_v61, %v751_v62 }
  0x58   :  { %680 = vmatprep.subr.bf16.mxu0 %v1870_v2 }
  0x59   :  { %1048 = vmatpush1.bf16.msra.mxu1 %v1890_v30 }
  0x5a   :  { %518 = vmatmul.mubr.bf16.gmra.mrb[12].mxu0 %v110_v7  ;;  %1049 = vmatprep.subr.bf16.mxu1 %v1891_v34 }
  0x5b   :  { %681 = vmatpush1.bf16.msra.mxu0 %v1868_v40  ;;  %1659 = vmatprep.mubr.msk.bf16.mxu0 %vm55_vm3, %v565_v9 }
  0x5c   :  { %682 = vmatprep.subr.bf16.mxu0 %v1873_v8 }
  0x5d   :  { %1050 = vmatpush1.bf16.msra.mxu1 %v1686_v35 }
  0x5e   :  { %1051 = vmatprep.subr.bf16.mxu1 %v1893_v36 }
  0x5f   :  { %683 = vmatpush1.bf16.msra.mxu0 %v1871_v10 }
  0x60   :  { %684 = vmatprep.subr.bf16.mxu0 %v1876_v47 }
  0x63   :  { %685 = vmatpush1.bf16.msra.mxu0 %v1874_v11 }
  0x64   :  { %686 = vmatprep.subr.bf16.mxu0 %v1879_v12 }
  0x67   :  { %687 = vmatpush1.bf16.msra.mxu0 %v1877_v14 }
  0x68   :  { %688 = vmatprep.subr.bf16.mxu0 %v1882_v15 }
  0x6b   :  { %689 = vmatpush1.bf16.msra.mxu0 %v1880_v17 }
  0x6e   :  { %705 = vmatmul.mubr.bf16.vlgmr.msra.gmra.mrb[0].mxu0 %v2156_v37  ;;  %v1895_v37 = vld [vmem:[%s2567_s2 + $0xd0] ss:$8 sps:$4 sm:$0xff]  }
  0x6f   :  { %1660 = vmatprep.mubr.msk.bf16.mxu0 %vm55_vm3, %v569_v21  ;;  %1052 = vmatpush1.bf16.msra.mxu1 %v1895_v37 }
  0x70   :  { %1053 = vmatprep.subr.bf16.mxu1 %v1896_v38 }
  0x73   :  { %1054 = vmatpush1.bf16.msra.mxu1 %v1898_v39 }
  0x74   :  { %1055 = vmatprep.subr.bf16.mxu1 %v1899_v41 }
  0x76   :  { %715 = vmatmul.mubr.bf16.gmra.mrb[4].mxu0 %v567_v23 }
  0x77   :  { %1661 = vmatprep.mubr.msk.bf16.mxu0 %vm55_vm3, %v568_v18  ;;  %1056 = vmatpush1.bf16.msra.mxu1 %v1901_v42 }
  0x78   :  { %1057 = vmatprep.subr.bf16.mxu1 %v1902_v43 }
  0x7b   :  { %1058 = vmatpush1.bf16.msra.mxu1 %v1904_v44 }
  0x7c   :  { %1059 = vmatprep.subr.bf16.mxu1 %v1905_v45 }
  0x7e   :  { %725 = vmatmul.mubr.bf16.gmra.mrb[16].mxu0 %v566_v22 }
  0x7f   :  { %1060 = vmatpush1.bf16.msra.mxu1 %v1907_v46 }
  0x80   :  { %1202 = vmatprep.subr.bf16.mxu1 %v1910_v48 }
 0x109   :  { %v360_v49 = vpop.f32.mrb[8].mxu0 }
 0x10a   :  { %v362_v50 = vpop.f32.mrb[9].mxu0 }
 0x10b   :  { %v364_v51 = vpop.f32.mrb[10].mxu0 }
 0x10c   :  { %v365_v52 = vpop.f32.mrb[11].mxu0 }
 0x12d   :  { %v519_v54 = vpop.f32.mrb[12].mxu0 }
 0x12e   :  { %v520_v55 = vadd.f32 %v519_v54, %v360_v49  ;;  %v521_v56 = vpop.f32.mrb[13].mxu0 }
 0x12f   :  { %v522_v32 = vadd.f32 %v521_v56, %v362_v50  ;;  %v523_v57 = vpop.f32.mrb[14].mxu0 }
 0x130   :  { %v524_v58 = vpop.f32.mrb[15].mxu0 }
 0x141   :  { %v706_v2 = vpop.f32.mrb[0].mxu0 }
 0x142   :  { %v755_v4 = vadd.f32 %v748_v63, %v706_v2  ;;  %v708_v6 = vpop.f32.mrb[1].mxu0 }
 0x143   :  { %v756_v7 = vadd.f32 %v752_v1, %v708_v6  ;;  %v710_v0 = vpop.f32.mrb[2].mxu0 }
 0x144   :  { %v765_v40 = vmax.f32 %v755_v4, 0.0  ;;  %v757_v8 = vadd.f32 %v748_v63, %v710_v0  ;;  %v712_v9 = vpop.f32.mrb[3].mxu0 }
 0x145   :  { %v766_v10 = vmax.f32 %v756_v7, 0.0  ;;  %v758_v47 = vadd.f32 %v752_v1, %v712_v9 }
 0x146   :  { %v785_v11 = vrot.slane %v765_v40, 7  ;;  %v767_v12 = vmax.f32 %v757_v8, 0.0 }
 0x147   :  { %v786_v13 = vrot.slane %v766_v10, 7  ;;  %v768_v14 = vmax.f32 %v758_v47, 0.0 }
 0x148   :  { %813 = vst [vmem:[#allocation3] sm:$0xfe] %v785_v11  ;;  %v787_v15 = vrot.slane %v767_v12, 7 }
 0x149   :  { %814 = vst.msk [vmem:[#allocation3 + $0x8] sm:$0xfe] %vm52_vm2, %v786_v13  ;;  %v789_v16 = vrot.slane %v768_v14, 7  ;;  %v716_v17 = vpop.f32.mrb[4].mxu0 }
 0x14a   :  { %v2334_v18 = vsel %vm38_vm1, %v785_v11, %v787_v15  ;;  %v759_v19 = vadd.f32 %v748_v63, %v716_v17  ;;  %v718_v20 = vpop.f32.mrb[5].mxu0 }
 0x14b   :  { %v790_v21 = vsel %vm38_vm1, %v786_v13, %v789_v16  ;;  %v760_v22 = vadd.f32 %v752_v1, %v718_v20  ;;  %v720_v23 = vpop.f32.mrb[6].mxu0  ;;  %v1908_v20 = vld [vmem:[%s2567_s2] ss:$8 sps:$4 sm:$0xff]  }
 0x14c   :  { %816 = vst.msk [vmem:[#allocation3 + $0x18] sm:$0xff] %vm55_vm3, %v790_v21  ;;  %v769_v24 = vmax.f32 %v759_v19, 0.0  ;;  %v761_v25 = vadd.f32 %v748_v63, %v720_v23  ;;  %v722_v53 = vpop.f32.mrb[7].mxu0  ;;  %v1913_v23 = vld [vmem:[%s2567_s2 + $0x14] ss:$8 sps:$4 sm:$0xff]  }
 0x14d   :  { %v770_v26 = vmax.f32 %v760_v22, 0.0  ;;  %v762_v27 = vadd.f32 %v752_v1, %v722_v53 }
 0x14e   :  { %v791_v28 = vrot.slane %v769_v24, 7  ;;  %v771_v29 = vmax.f32 %v761_v25, 0.0 }
 0x14f   :  { %v793_v30 = vrot.slane %v770_v26, 7  ;;  %v772_v31 = vmax.f32 %v762_v27, 0.0  ;;  %v868_v35 = vld [vmem:[#allocation3] sm:$0xfe] }
 0x150   :  { %v792_v33 = vsel %vm38_vm1, %v787_v15, %v791_v28  ;;  %v795_v34 = vrot.slane %v771_v29, 7  ;;  %v869_v48 = vld [vmem:[#allocation3 + $0x8] sm:$0xfe]  ;;  %v872_v49 = vpack.c.bf16 %v2334_v18, %v868_v35  ;;  %v1263_v56 = vld [vmem:[#allocation3] sm:$0xfc] }
 0x151   :  { %817 = vst [vmem:[#allocation3 + $0x20] sm:$0xff] %v792_v33  ;;  %v794_v36 = vsel %vm38_vm1, %v789_v16, %v793_v30  ;;  %v797_v37 = vrot.slane %v772_v31, 7  ;;  %v726_v38 = vpop.f32.mrb[16].mxu0  ;;  %v1267_v61 = vpack.c.bf16 %v2334_v18, %v1263_v56  ;;  %v1911_v27 = vld [vmem:[%s2567_s2 + $0x10] ss:$8 sps:$4 sm:$0xff]  }
 0x152   :  { %818 = vst.msk [vmem:[#allocation3 + $0x28] sm:$0xff] %vm55_vm3, %v794_v36  ;;  %v796_v39 = vsel %vm38_vm1, %v791_v28, %v795_v34  ;;  %v741_v41 = vadd.f32 %v726_v38, %v520_v55  ;;  %v728_v42 = vpop.f32.mrb[17].mxu0  ;;  %v896_v9 = vshrl.u32 %v872_v49, 16  ;;  %v1916_v31 = vld [vmem:[%s2567_s2 + $0x24] ss:$8 sps:$4 sm:$0xff]  }
 0x153   :  { %826 = vst.msk [vmem:[#allocation3 + $0x21] ss:$8 sm:$0x3] %vm2000_vm0, %v1962_v5  ;;  %829 = vst.msk [vmem:[#allocation3 + $0x22] ss:$8 sm:$0x3] %vm2000_vm0, %v1962_v5  ;;  %v798_v43 = vsel %vm38_vm1, %v793_v30, %v797_v37  ;;  %v742_v44 = vadd.f32 %v728_v42, %v522_v32 }
 0x154   :  { %v730_v45 = vpop.f32.mrb[18].mxu0  ;;  %v2349_v46 = vld [vmem:[#allocation3 + $0x18] sm:$0xff]  ;;  %820 = vst.msk [vmem:[#allocation3 + $0x38] sm:$0xff] %vm55_vm3, %v798_v43  ;;  %v763_v50 = vadd.f32 %v748_v63, %v741_v41  ;;  %v898_v5 = vshll.u32 %v872_v49, 16  ;;  %v1296_v47 = vrot.slane %v1267_v61, 1 }
 0x155   :  { %v731_v51 = vpop.f32.mrb[19].mxu0  ;;  %v873_v52 = vpack.c.bf16 %v2349_v46, %v869_v48  ;;  %v764_v54 = vadd.f32 %v752_v1, %v742_v44  ;;  %v1914_v38 = vld [vmem:[%s2567_s2 + $0x20] ss:$8 sps:$4 sm:$0xff]   ;;  %v1919_v43 = vld [vmem:[%s2567_s2 + $0x34] ss:$8 sps:$4 sm:$0xff]  }
 0x156   :  { %v773_v55 = vmax.f32 %v763_v50, 0.0  ;;  %v900_v1 = vrot.slane %v898_v5, 1  ;;  %v1917_v45 = vld [vmem:[%s2567_s2 + $0x30] ss:$8 sps:$4 sm:$0xff]   ;;  %v1922_v48 = vld [vmem:[%s2567_s2 + $0x44] ss:$8 sps:$4 sm:$0xff]  }
 0x157   :  { %v774_v3 = vmax.f32 %v764_v54, 0.0  ;;  %v910_v58 = vshll.u32 %v873_v52, 16  ;;  %v908_v12 = vshrl.u32 %v873_v52, 16  ;;  %v1920_v50 = vld [vmem:[%s2567_s2 + $0x40] ss:$8 sps:$4 sm:$0xff]   ;;  %v835_v52 = vld [vmem:[#allocation3 + $0x8] sm:$0xff] }
 0x158   :  { %v799_v57 = vrot.slane %v773_v55, 7  ;;  %v901_v14 = vor.u32 %v900_v1, %v896_v9  ;;  %v1925_v54 = vld [vmem:[%s2567_s2 + $0x54] ss:$8 sps:$4 sm:$0xff]   ;;  %v845_v55 = vpack.c.bf16 %v2349_v46, %v835_v52  ;;  %v1923_v56 = vld [vmem:[%s2567_s2 + $0x50] ss:$8 sps:$4 sm:$0xff]   ;;  %v1501_v52 = vld [vmem:[%s2566_s0] sm:$0xff] }
 0x159   :  { %v801_v32 = vrot.slane %v774_v3, 7  ;;  %v912_v8 = vrot.slane %v910_v58, 1  ;;  %v1928_v3 = vld [vmem:[%s2567_s2 + $0x64] ss:$8 sps:$4 sm:$0xff]   ;;  %v1926_v5 = vld [vmem:[%s2567_s2 + $0x60] ss:$8 sps:$4 sm:$0xff]  }
 0x15a   :  { %v800_v2 = vsel %vm38_vm1, %v795_v34, %v799_v57  ;;  %v839_v4 = vld [vmem:[#allocation3 + $0x28] sm:$0xff]  ;;  %v838_v6 = vld [vmem:[#allocation3 + $0x20] sm:$0xff]  ;;  %v1932_v61 = vld [vmem:[%s2567_s2 + $0x80] ss:$8 sps:$4 sm:$0xff]  }
 0x15b   :  { %821 = vst [vmem:[#allocation3 + $0x40] sm:$0x7] %v800_v2  ;;  %v802_v63 = vsel %vm38_vm1, %v797_v37, %v801_v32  ;;  %v841_v7 = vld [vmem:[#allocation3 + $0x38] sm:$0xff]  ;;  %v2357_v0 = vpack.c.bf16 %v796_v39, %v838_v6  ;;  %v913_v17 = vor.u32 %v912_v8, %v908_v12  ;;  %v1931_v57 = vld [vmem:[%s2567_s2 + $0x74] ss:$8 sps:$4 sm:$0xff]  }
 0x15c   :  { %822 = vst.msk [vmem:[#allocation3 + $0x48] sm:$0x7] %vm94_vm7, %v802_v63  ;;  %v2360_v40 = vpack.c.bf16 %v841_v7, %v839_v4  ;;  %v1929_v58 = vld [vmem:[%s2567_s2 + $0x70] ss:$8 sps:$4 sm:$0xff]   ;;  %v1934_v32 = vld [vmem:[%s2567_s2 + $0x84] ss:$8 sps:$4 sm:$0xff]  }
 0x15d   :  { %v903_v10 = vshll.u32 %v2357_v0, 16  ;;  %v1297_v11 = vrot.slane %v2357_v0, 1  ;;  %v919_v33 = vshrl.u32 %v2357_v0, 16  ;;  %v1937_v2 = vld [vmem:[%s2567_s2 + $0x124] ss:$8 sps:$4 sm:$0xff]   ;;  %v834_v4 = vld [vmem:[#allocation3] sm:$0xff] }
 0x15e   :  { %v915_v13 = vshll.u32 %v2360_v40, 16  ;;  %v927_v29 = vshrl.u32 %v2360_v40, 16  ;;  %v1935_v6 = vld [vmem:[%s2567_s2 + $0x120] ss:$8 sps:$4 sm:$0xff]   ;;  %v844_v63 = vpack.c.bf16 %v2334_v18, %v834_v4  ;;  %v1940_v7 = vld [vmem:[%s2567_s2 + $0x134] ss:$8 sps:$4 sm:$0xff]  }
 0x15f   :  { %v905_v15 = vrot.slane %v903_v10, 1  ;;  %v2368_v16 = vsel %vm559_vm9, %v1296_v47, %v1297_v11  ;;  %v1938_v1 = vld [vmem:[%s2567_s2 + $0x130] ss:$8 sps:$4 sm:$0xff]   ;;  %v1943_v8 = vld [vmem:[%s2567_s2 + $0x144] ss:$8 sps:$4 sm:$0xff]  }
 0x160   :  { %v917_v19 = vrot.slane %v915_v13, 1  ;;  %v1941_v9 = vld [vmem:[%s2567_s2 + $0x140] ss:$8 sps:$4 sm:$0xff]   ;;  %v1946_v10 = vld [vmem:[%s2567_s2 + $0x154] ss:$8 sps:$4 sm:$0xff]  }
 0x161   :  { %v906_v21 = vsel %vm157_vm8, %v901_v14, %v905_v15  ;;  %v921_v39 = vor.u32 %v919_v33, %v905_v15  ;;  %v1944_v12 = vld [vmem:[%s2567_s2 + $0x150] ss:$8 sps:$4 sm:$0xff]   ;;  %v1949_v14 = vld [vmem:[%s2567_s2 + $0x164] ss:$8 sps:$4 sm:$0xff]  }
 0x162   :  { %v918_v22 = vsel %vm157_vm8, %v913_v17, %v917_v19  ;;  %v870_v24 = vld [vmem:[#allocation3 + $0x40] sm:$0x7]  ;;  %v929_v35 = vor.u32 %v927_v29, %v917_v19  ;;  %v1264_v13 = vld [vmem:[#allocation3 + $0x8] sm:$0xfc]  ;;  %v1300_v19 = vrot.slane %v2360_v40, 1 }
 0x163   :  { %1698 = vmatprep.mubr.msk.bf16.mxu1 %vm55_vm3, %v918_v22  ;;  %v871_v25 = vld [vmem:[#allocation3 + $0x48] sm:$0x7]  ;;  %v874_v53 = vpack.c.bf16 %v870_v24, %v870_v24  ;;  %v1268_v15 = vpack.c.bf16 %v2349_v46, %v1264_v13  ;;  %v842_v17 = vld [vmem:[#allocation3 + $0x40] sm:$0x3] }
 0x164   :  { %1076 = vmatmul.mubr.bf16.vlgmr.msra.gmra.mrb[0].mxu1 %v906_v21  ;;  %v875_v26 = vpack.c.bf16 %v871_v25, %v871_v25  ;;  %v843_v18 = vld [vmem:[#allocation3 + $0x48] sm:$0x3]  ;;  %v848_v21 = vpack.c.bf16 %v842_v17, %v842_v17  ;;  %v1953_v25 = vld [vmem:[%s2567_s2 + $0x180] ss:$8 sps:$4 sm:$0xff]   ;;  %v1265_v33 = vld [vmem:[#allocation3 + $0x40] sm:$0xf] }
 0x165   :  { %1203 = vmatpush1.bf16.msra.mxu1 %v1908_v20  ;;  %v923_v28 = vshll.u32 %v874_v53, 16  ;;  %v935_v49 = vshrl.u32 %v874_v53, 16  ;;  %v849_v47 = vpack.c.bf16 %v843_v18, %v843_v18  ;;  %v1947_v20 = vld [vmem:[%s2567_s2 + $0x160] ss:$8 sps:$4 sm:$0xff]   ;;  %v1299_v22 = vrot.slane %v1268_v15, 1 }
 0x166   :  { %1204 = vmatprep.subr.bf16.mxu1 %v1913_v23  ;;  %v931_v30 = vshll.u32 %v875_v26, 16  ;;  %v938_v37 = vshrl.u32 %v875_v26, 16  ;;  %v1952_v23 = vld [vmem:[%s2567_s2 + $0x174] ss:$8 sps:$4 sm:$0xff]   ;;  %v1950_v46 = vld [vmem:[%s2567_s2 + $0x170] ss:$8 sps:$4 sm:$0xff]  }
 0x167   :  { %v925_v34 = vrot.slane %v923_v28, 1  ;;  %v1301_v24 = vsel %vm559_vm9, %v1299_v22, %v1300_v19  ;;  %v1958_v53 = vld [vmem:[%s2567_s2 + $0x194] ss:$8 sps:$4 sm:$0xff]   ;;  %v1956_v26 = vld [vmem:[%s2567_s2 + $0x190] ss:$8 sps:$4 sm:$0xff]   ;;  %v1761_v17 = vld [vmem:[%s2566_s0 + $0x20] sm:$0xff] }
 0x168   :  { %v933_v36 = vrot.slane %v931_v30, 1  ;;  %v1961_v28 = vld [vmem:[%s2567_s2 + $0x1a4] ss:$8 sps:$4 sm:$0xff]   ;;  %v1959_v30 = vld [vmem:[%s2567_s2 + $0x1a0] ss:$8 sps:$4 sm:$0xff]  }
 0x169   :  { %1205 = vmatpush1.bf16.msra.mxu1 %v1911_v27  ;;  %v926_v44 = vsel %vm157_vm8, %v921_v39, %v925_v34  ;;  %v937_v51 = vor.u32 %v935_v49, %v925_v34  ;;  %v1266_v27 = vld [vmem:[#allocation3 + $0x48] sm:$0xf]  ;;  %v1269_v34 = vpack.c.bf16 %v1265_v33, %v1265_v33 }
 0x16a   :  { %v934_v41 = vsel %vm157_vm8, %v929_v35, %v933_v36  ;;  %1206 = vmatprep.subr.bf16.mxu1 %v1916_v31  ;;  %v940_v42 = vor.u32 %v938_v37, %v933_v36  ;;  %v1270_v29 = vpack.c.bf16 %v1266_v27, %v1266_v27 }
 0x16b   :  { %1699 = vmatprep.mubr.msk.bf16.mxu1 %vm55_vm3, %v934_v41  ;;  %v1302_v36 = vrot.slane %v1269_v34, 1 }
 0x16c   :  { %1086 = vmatmul.mubr.bf16.gmra.mrb[4].mxu1 %v926_v44  ;;  %v1304_v31 = vrot.slane %v1270_v29, 1 }
 0x16d   :  { %1207 = vmatpush1.bf16.msra.mxu1 %v1914_v38  ;;  %1700 = vmatprep.mubr.msk.bf16.mxu1 %vm55_vm3, %v940_v42  ;;  %v1303_v37 = vsel %vm559_vm9, %v1297_v11, %v1302_v36 }
 0x16e   :  { %1208 = vmatprep.subr.bf16.mxu1 %v1919_v43  ;;  %v1305_v35 = vsel %vm559_vm9, %v1300_v19, %v1304_v31 }
 0x171   :  { %1209 = vmatpush1.bf16.msra.mxu1 %v1917_v45 }
 0x172   :  { %1210 = vmatprep.subr.bf16.mxu1 %v1922_v48 }
 0x174   :  { %1096 = vmatmul.mubr.bf16.gmra.mrb[8].mxu1 %v937_v51 }
 0x175   :  { %1211 = vmatpush1.bf16.msra.mxu1 %v1920_v50  ;;  %1719 = vmatprep.mubr.msk.bf16.mxu1 %vm55_vm3, %v845_v55 }
 0x176   :  { %1212 = vmatprep.subr.bf16.mxu1 %v1925_v54 }
 0x179   :  { %1213 = vmatpush1.bf16.msra.mxu1 %v1923_v56  ;;  %v1502_v56 = vld [vmem:[%s2566_s0 + $0x8] sm:$0xff] }
 0x17a   :  { %1214 = vmatprep.subr.bf16.mxu1 %v1928_v3 }
 0x17d   :  { %1215 = vmatpush1.bf16.msra.mxu1 %v1926_v5 }
 0x17e   :  { %1216 = vmatprep.subr.bf16.mxu1 %v1931_v57 }
 0x181   :  { %1217 = vmatpush1.bf16.msra.mxu1 %v1929_v58  ;;  %v1504_v58 = vld [vmem:[%s2566_s0 + $0x18] sm:$0xff] }
 0x182   :  { %1218 = vmatprep.subr.bf16.mxu1 %v1934_v32 }
 0x185   :  { %1219 = vmatpush1.bf16.msra.mxu1 %v1932_v61 }
 0x186   :  { %1408 = vmatprep.subr.bf16.mxu1 %v1937_v2 }
 0x188   :  { %1235 = vmatmul.mubr.bf16.vlgmr.msra.gmra.mrb[0].mxu1 %v844_v63 }
 0x189   :  { %1720 = vmatprep.mubr.msk.bf16.mxu1 %vm55_vm3, %v2360_v40  ;;  %1409 = vmatpush1.bf16.msra.mxu1 %v1935_v6  ;;  %v1955_v40 = vld [vmem:[%s2567_s2 + $0x184] ss:$8 sps:$4 sm:$0xff]  }
 0x18a   :  { %1410 = vmatprep.subr.bf16.mxu1 %v1940_v7 }
 0x18d   :  { %1411 = vmatpush1.bf16.msra.mxu1 %v1938_v1 }
 0x18e   :  { %1412 = vmatprep.subr.bf16.mxu1 %v1943_v8 }
 0x190   :  { %1245 = vmatmul.mubr.bf16.gmra.mrb[4].mxu1 %v2357_v0  ;;  %v1479_v0 = vld [vmem:[%s2569_s4] sm:$0x3] }
 0x191   :  { %1721 = vmatprep.mubr.msk.bf16.mxu1 %vm55_vm3, %v849_v47  ;;  %1413 = vmatpush1.bf16.msra.mxu1 %v1941_v9  ;;  %v1484_v11 = vrot.slane %v1479_v0, %v747_v60  ;;  %v1488_v50 = vrot.slane %v1479_v0, %v751_v62  ;;  %v1503_v60 = vld [vmem:[%s2566_s0 + $0x10] sm:$0xff] }
 0x192   :  { %1414 = vmatprep.subr.bf16.mxu1 %v1946_v10 }
 0x195   :  { %1415 = vmatpush1.bf16.msra.mxu1 %v1944_v12 }
 0x196   :  { %1416 = vmatprep.subr.bf16.mxu1 %v1949_v14 }
 0x198   :  { %1255 = vmatmul.mubr.bf16.gmra.mrb[12].mxu1 %v848_v21  ;;  %v1762_v21 = vld [vmem:[%s2566_s0 + $0x28] sm:$0xff] }
 0x199   :  { %1417 = vmatpush1.bf16.msra.mxu1 %v1947_v20  ;;  %1758 = vmatprep.mubr.msk.bf16.mxu1 %vm55_vm3, %v1301_v24 }
 0x19a   :  { %1418 = vmatprep.subr.bf16.mxu1 %v1952_v23 }
 0x19d   :  { %1419 = vmatpush1.bf16.msra.mxu1 %v1950_v46 }
 0x19e   :  { %1420 = vmatprep.subr.bf16.mxu1 %v1955_v40 }
 0x1a1   :  { %1421 = vmatpush1.bf16.msra.mxu1 %v1953_v25 }
 0x1a2   :  { %1422 = vmatprep.subr.bf16.mxu1 %v1958_v53 }
 0x1a5   :  { %1423 = vmatpush1.bf16.msra.mxu1 %v1956_v26 }
 0x1a6   :  { %1424 = vmatprep.subr.bf16.mxu1 %v1961_v28 }
 0x1a9   :  { %1425 = vmatpush1.bf16.msra.mxu1 %v1959_v30 }
 0x1ac   :  { %1441 = vmatmul.mubr.bf16.vlgmr.msra.gmra.mrb[0].mxu1 %v2368_v16 }
 0x1ad   :  { %1759 = vmatprep.mubr.msk.bf16.mxu1 %vm55_vm3, %v1305_v35  ;;  %v1763_v35 = vld [vmem:[%s2566_s0 + $0x30] sm:$0xff] }
 0x1b4   :  { %1451 = vmatmul.mubr.bf16.gmra.mrb[4].mxu1 %v1303_v37  ;;  %v1764_v37 = vld [vmem:[%s2566_s0 + $0x38] sm:$0xff] }
 0x1b5   :  { %1760 = vmatprep.mubr.msk.bf16.mxu1 %vm55_vm3, %v1304_v31 }
 0x1bc   :  { %1461 = vmatmul.mubr.bf16.gmra.mrb[16].mxu1 %v1302_v36 }
 0x247   :  { %v1097_v38 = vpop.f32.mrb[8].mxu1 }
 0x248   :  { %v1099_v39 = vpop.f32.mrb[9].mxu1 }
 0x249   :  { %v1101_v41 = vpop.f32.mrb[10].mxu1 }
 0x24a   :  { %v1102_v42 = vpop.f32.mrb[11].mxu1 }
 0x26b   :  { %v1256_v43 = vpop.f32.mrb[12].mxu1 }
 0x26c   :  { %v1257_v44 = vadd.f32 %v1256_v43, %v1097_v38  ;;  %v1258_v16 = vpop.f32.mrb[13].mxu1 }
 0x26d   :  { %v1259_v45 = vadd.f32 %v1258_v16, %v1099_v39  ;;  %v1260_v48 = vpop.f32.mrb[14].mxu1 }
 0x26e   :  { %v1261_v49 = vpop.f32.mrb[15].mxu1 }
 0x27f   :  { %v1442_v51 = vpop.f32.mrb[0].mxu1 }
 0x280   :  { %v1491_v54 = vadd.f32 %v1484_v11, %v1442_v51  ;;  %v1444_v55 = vpop.f32.mrb[1].mxu1 }
 0x281   :  { %v1492_v3 = vadd.f32 %v1488_v50, %v1444_v55  ;;  %v1446_v5 = vpop.f32.mrb[2].mxu1 }
 0x282   :  { %v1505_v57 = vadd.f32 %v1501_v52, %v1491_v54  ;;  %v1493_v59 = vadd.f32 %v1484_v11, %v1446_v5  ;;  %v1448_v62 = vpop.f32.mrb[3].mxu1 }
 0x283   :  { %v1506_v32 = vadd.f32 %v1502_v56, %v1492_v3  ;;  %v1494_v61 = vadd.f32 %v1488_v50, %v1448_v62 }
 0x284   :  { %v1509_v2 = vmax.f32 %v1505_v57, 0.0  ;;  %v1507_v4 = vadd.f32 %v1503_v60, %v1493_v59 }
 0x285   :  { %v1510_v6 = vmax.f32 %v1506_v32, 0.0  ;;  %v1508_v63 = vadd.f32 %v1504_v58, %v1494_v61 }
 0x286   :  { %1513 = vst [vmem:[%s2570_s5] sm:$0xff] %v1509_v2  ;;  %v1511_v7 = vmax.f32 %v1507_v4, 0.0 }
 0x287   :  { %1514 = vst.msk [vmem:[%s2570_s5 + $0x8] sm:$0xff] %vm55_vm3, %v1510_v6  ;;  %v1512_v1 = vmax.f32 %v1508_v63, 0.0  ;;  %v1452_v8 = vpop.f32.mrb[4].mxu1 }
 0x288   :  { %1515 = vst [vmem:[%s2570_s5 + $0x10] sm:$0xff] %v1511_v7  ;;  %v1495_v18 = vadd.f32 %v1484_v11, %v1452_v8  ;;  %v1454_v9 = vpop.f32.mrb[5].mxu1 }
 0x289   :  { %1516 = vst.msk [vmem:[%s2570_s5 + $0x18] sm:$0xff] %vm55_vm3, %v1512_v1  ;;  %v1496_v10 = vadd.f32 %v1488_v50, %v1454_v9  ;;  %v1456_v47 = vpop.f32.mrb[6].mxu1 }
 0x28a   :  { %v1497_v12 = vadd.f32 %v1484_v11, %v1456_v47  ;;  %v1458_v13 = vpop.f32.mrb[7].mxu1  ;;  %v1528_v15 = vrot.slane %v1495_v18, 2 }
 0x28b   :  { %v1498_v14 = vadd.f32 %v1488_v50, %v1458_v13  ;;  %v1531_v20 = vrot.slane %v1496_v10, 2 }
 0x28c   :  { %v1529_v19 = vrot.slane %v1497_v12, 2 }
 0x28d   :  { %v1532_v22 = vrot.slane %v1498_v14, 2 }
 0x28e   :  { %v1530_v23 = vsel %vm1527_vm10, %v1528_v15, %v1529_v19 }
 0x28f   :  { %v1542_v24 = vadd.f32 %v1761_v17, %v1530_v23  ;;  %v1533_v46 = vsel %vm1527_vm10, %v1531_v20, %v1532_v22  ;;  %v1462_v40 = vpop.f32.mrb[16].mxu1 }
 0x290   :  { %v1543_v25 = vadd.f32 %v1762_v21, %v1533_v46  ;;  %v1477_v53 = vadd.f32 %v1462_v40, %v1257_v44  ;;  %v1464_v26 = vpop.f32.mrb[17].mxu1 }
 0x291   :  { %v1546_v27 = vmax.f32 %v1542_v24, 0.0  ;;  %v1478_v28 = vadd.f32 %v1464_v26, %v1259_v45  ;;  %v1466_v29 = vpop.f32.mrb[18].mxu1 }
 0x292   :  { %v1547_v30 = vmax.f32 %v1543_v25, 0.0  ;;  %v1499_v31 = vadd.f32 %v1484_v11, %v1477_v53  ;;  %v1467_v33 = vpop.f32.mrb[19].mxu1 }
 0x293   :  { %1765 = vst [vmem:[%s2570_s5 + $0x20] sm:$0xff] %v1546_v27  ;;  %v1500_v34 = vadd.f32 %v1488_v50, %v1478_v28 }
 0x294   :  { %1766 = vst.msk [vmem:[%s2570_s5 + $0x28] sm:$0xff] %vm55_vm3, %v1547_v30  ;;  %v1534_v36 = vrot.slane %v1499_v31, 2 }
 0x295   :  { %v1536_v38 = vrot.slane %v1500_v34, 2 }
 0x296   :  { %v1535_v39 = vsel %vm1527_vm10, %v1529_v19, %v1534_v36 }
 0x297   :  { %v1544_v41 = vadd.f32 %v1763_v35, %v1535_v39  ;;  %v1537_v42 = vsel %vm1527_vm10, %v1532_v22, %v1536_v38 }
 0x298   :  { %v1545_v43 = vadd.f32 %v1764_v37, %v1537_v42 }
 0x299   :  { %v1548_v44 = vmax.f32 %v1544_v41, 0.0 }
 0x29a   :  { %v1549_v16 = vmax.f32 %v1545_v43, 0.0 }
 0x29b   :  { %1767 = vst [vmem:[%s2570_s5 + $0x30] sm:$0xff] %v1548_v44 }
 0x29c   :  { %1768 = vst.msk [vmem:[%s2570_s5 + $0x38] sm:$0xff] %vm55_vm3, %v1549_v16 }

</bundles_post_ra>
